<compile_context>
chip_gen: v6e
topology: v6e:2x2x1
jax: 0.10.0
libtpu: 0.0.40
codegen_flags: <defaults>
</compile_context>

<pallas_src>
import functools

import jax
import jax.numpy as jnp
from jax.experimental import pallas as pl
from jax.experimental.pallas import tpu as pltpu


def _fsts_kernel(x_ref, w_ref, mask_ref, bconv_ref, bias_ref, scale_ref,
                 o_ref, *, W):
    # x_ref:     (1, C, S)  one image, channels in sublanes, S=H*W in lanes
    # w_ref:     (9, C, C)  conv taps, w_ref[ky*3+kx][co, ci] = conv_w[co,ci,ky,kx]
    # mask_ref:  (9, 1, S)  0/1 validity masks for the shifted taps
    # bconv_ref: (C, 1)     conv bias
    # bias_ref:  (C, 1)     FSTS bias
    # scale_ref: (1,)       weight1 * weight2 (SMEM scalar)
    # o_ref:     (1, C, S)
    C = x_ref.shape[1]
    S = x_ref.shape[2]

    x = x_ref[0]                                         # (C, S)

    # Accumulator starts at the broadcast conv bias (drops a separate add).
    acc = jnp.broadcast_to(bconv_ref[...], (C, S)).astype(jnp.float32)

    for ky in range(3):
        for kx in range(3):
            t = ky * 3 + kx
            d = (ky - 1) * W + (kx - 1)   # flat offset of this tap's source
            if d == 0:
                src = x                   # center tap: no shift, no mask
            else:
                # src[:, p] == x[:, p + d] for in-bounds neighbours; wrapped /
                # out-of-bounds lanes are zeroed by the mask (== the conv's
                # zero "same" padding).
                src = pltpu.roll(x, shift=(-d) % S, axis=1) * mask_ref[t]
            acc = acc + jnp.dot(w_ref[t], src,
                                preferred_element_type=jnp.float32)

    y = acc                                              # conv output x1
    out = scale_ref[0] * (y * y) + bias_ref[...]         # (w1*x1)*(w2*x1)+bias
    o_ref[...] = out.reshape(1, C, S).astype(o_ref.dtype)


def fsts_forward(x_nchw, conv_w, conv_b, weight1, weight2, bias):
    """FSTS forward.

    x_nchw : (B, C, H, W)  float32
    conv_w : (C, C, 3, 3)  float32 (out_ch, in_ch, kh, kw) -- PyTorch layout
    conv_b : (C,)          float32
    weight1, weight2 : scalar float32
    bias   : (1, C, 1, 1)  float32
    returns (B, C, H, W) float32
    """
    B, C, H, W = x_nchw.shape
    S = H * W

    # Free, contiguous reshape only -- no transposes, no HBM padding pass.
    x_flat = x_nchw.reshape(B, C, S).astype(jnp.float32)

    # (Cout, Cin, 3, 3) -> (9, Cout, Cin), tap index t = ky*3 + kx.
    w_taps = jnp.transpose(conv_w, (2, 3, 0, 1)).reshape(9, C, C)
    w_taps = w_taps.astype(jnp.float32)

    # Precomputed 0/1 boundary masks per tap (constant, tiny: 9*S floats).
    ry = jnp.arange(H)
    cx = jnp.arange(W)
    mask_list = []
    for ky in range(3):
        for kx in range(3):
            dy, dx = ky - 1, kx - 1
            mrow = (ry + dy >= 0) & (ry + dy < H)        # (H,)
            mcol = (cx + dx >= 0) & (cx + dx < W)        # (W,)
            mask_list.append((mrow[:, None] & mcol[None, :]).reshape(S))
    masks = jnp.stack(mask_list).reshape(9, 1, S).astype(jnp.float32)

    bconv2d = conv_b.reshape(C, 1).astype(jnp.float32)
    bias2d = bias.reshape(C, 1).astype(jnp.float32)
    scale = jnp.reshape(weight1 * weight2, (1,)).astype(jnp.float32)

    kernel = functools.partial(_fsts_kernel, W=W)

    # TODO(synk): for large images (v7x's 64 MiB VMEM) add H-tiling with a
    # 1-row halo instead of one whole image per block.
    out_flat = pl.pallas_call(
        kernel,
        out_shape=jax.ShapeDtypeStruct((B, C, S), jnp.float32),
        grid_spec=pltpu.PrefetchScalarGridSpec(
            num_scalar_prefetch=0,
            grid=(B,),
            in_specs=[
                pl.BlockSpec((1, C, S), lambda b: (b, 0, 0)),
                pl.BlockSpec((9, C, C), lambda b: (0, 0, 0)),
                pl.BlockSpec((9, 1, S), lambda b: (0, 0, 0)),
                pl.BlockSpec((C, 1), lambda b: (0, 0)),
                pl.BlockSpec((C, 1), lambda b: (0, 0)),
                pl.BlockSpec(memory_space=pltpu.MemorySpace.SMEM),
            ],
            out_specs=pl.BlockSpec((1, C, S), lambda b: (b, 0, 0)),
        ),
        compiler_params=pltpu.CompilerParams(
            dimension_semantics=("parallel",)),
    )(x_flat, w_taps, masks, bconv2d, bias2d, scale)

    return out_flat.reshape(B, C, H, W)


def _reference(x_nchw, conv_w, conv_b, weight1, weight2, bias):
    """Pure-JAX reference matching the PyTorch forward."""
    x1 = jax.lax.conv_general_dilated(
        x_nchw, conv_w, window_strides=(1, 1), padding="SAME",
        dimension_numbers=("NCHW", "OIHW", "NCHW"))
    x1 = x1 + conv_b.reshape(1, -1, 1, 1)
    return (weight1 * x1) * (weight2 * x1) + bias


if __name__ == "__main__":
    B, C, H, W = 2, 4, 16, 16
    key = jax.random.PRNGKey(0)
    k_x, k_w, k_b, k_w1, k_w2, k_bias = jax.random.split(key, 6)

    x = jax.random.normal(k_x, (B, C, H, W), jnp.float32)
    conv_w = jax.random.normal(k_w, (C, C, 3, 3), jnp.float32) * 0.1
    conv_b = jax.random.normal(k_b, (C,), jnp.float32) * 0.1
    weight1 = jax.random.normal(k_w1, (), jnp.float32)
    weight2 = jax.random.normal(k_w2, (), jnp.float32)
    bias = jax.random.normal(k_bias, (1, C, 1, 1), jnp.float32)

    out = fsts_forward(x, conv_w, conv_b, weight1, weight2, bias)
    out = jax.block_until_ready(out)

    ref = _reference(x, conv_w, conv_b, weight1, weight2, bias)
    assert out.shape == (B, C, H, W)
    assert jnp.allclose(out, ref, atol=1e-3, rtol=1e-3), "mismatch vs reference"

    print("KERNEL_OK")
</pallas_src>

<mosaic_0001>
module attributes {stable_mosaic.version = 11 : i64} {
  func.func @_fsts_kernel(%arg0: i32, %arg1: memref<1x4x256xf32, #tpu.memory_space<vmem>>, %arg2: memref<9x4x4xf32, #tpu.memory_space<vmem>>, %arg3: memref<9x1x256xf32, #tpu.memory_space<vmem>>, %arg4: memref<4x1xf32, #tpu.memory_space<vmem>>, %arg5: memref<4x1xf32, #tpu.memory_space<vmem>>, %arg6: memref<1xf32, #tpu.memory_space<smem>>, %arg7: memref<1x4x256xf32, #tpu.memory_space<vmem>>) attributes {dimension_semantics = [#tpu.dimension_semantics<parallel>], iteration_bounds = array<i64: 2>, scalar_prefetch = 0 : i64, scratch_operands = 0 : i64, tpu.core_type = #tpu.core_type<tc>, window_params = [{transform_indices = @transform_0, window_bounds = array<i64: 1, 4, 256>}, {pipeline_mode = #tpu.pipeline_mode<synchronous>, transform_indices = @transform_1, window_bounds = array<i64: 9, 4, 4>}, {pipeline_mode = #tpu.pipeline_mode<synchronous>, transform_indices = @transform_2, window_bounds = array<i64: 9, 1, 256>}, {pipeline_mode = #tpu.pipeline_mode<synchronous>, transform_indices = @transform_3, window_bounds = array<i64: 4, 1>}, {pipeline_mode = #tpu.pipeline_mode<synchronous>, transform_indices = @transform_4, window_bounds = array<i64: 4, 1>}, {transform_indices = @transform_5, window_bounds = array<i64: 1>}, {transform_indices = @transform_6, window_bounds = array<i64: 1, 4, 256>}]} {
    %c0 = arith.constant 0 : index
    %c0_0 = arith.constant 0 : index
    %c0_1 = arith.constant 0 : index
    %0 = vector.load %arg1[%c0, %c0_0, %c0_1] : memref<1x4x256xf32, #tpu.memory_space<vmem>>, vector<1x4x256xf32>
    %1 = vector.shape_cast %0 : vector<1x4x256xf32> to vector<4x256xf32>
    %c0_2 = arith.constant 0 : index
    %c0_3 = arith.constant 0 : index
    %2 = vector.load %arg4[%c0_2, %c0_3] : memref<4x1xf32, #tpu.memory_space<vmem>>, vector<4x1xf32>
    %3 = vector.shape_cast %2 : vector<4x1xf32> to vector<4x1xf32>
    %4 = vector.broadcast %3 : vector<4x1xf32> to vector<4x256xf32>
    %c17_i32 = arith.constant 17 : i32
    %5 = tpu.dynamic_rotate %1 by %c17_i32 dim 1 : vector<4x256xf32>, i32 -> vector<4x256xf32>
    %c0_4 = arith.constant 0 : index
    %c0_5 = arith.constant 0 : index
    %c0_6 = arith.constant 0 : index
    %6 = vector.load %arg3[%c0_4, %c0_5, %c0_6] : memref<9x1x256xf32, #tpu.memory_space<vmem>>, vector<1x1x256xf32>
    %7 = vector.shape_cast %6 : vector<1x1x256xf32> to vector<1x256xf32>
    %8 = vector.broadcast %7 : vector<1x256xf32> to vector<4x256xf32>
    %9 = arith.mulf %5, %8 : vector<4x256xf32>
    %c0_7 = arith.constant 0 : index
    %c0_8 = arith.constant 0 : index
    %c0_9 = arith.constant 0 : index
    %10 = vector.load %arg2[%c0_7, %c0_8, %c0_9] : memref<9x4x4xf32, #tpu.memory_space<vmem>>, vector<1x4x4xf32>
    %11 = vector.shape_cast %10 : vector<1x4x4xf32> to vector<4x4xf32>
    %cst = arith.constant dense<0.000000e+00> : vector<4x256xf32>
    %12 = tpu.matmul %11, %9, %cst {dimension_numbers = #tpu.dot_dimension_numbers<[1], [0], [0], [1], [0, 0, 1, 1], [], []>} : vector<4x4xf32>, vector<4x256xf32>, vector<4x256xf32> -> vector<4x256xf32>
    %13 = arith.addf %4, %12 : vector<4x256xf32>
    %c16_i32 = arith.constant 16 : i32
    %14 = tpu.dynamic_rotate %1 by %c16_i32 dim 1 : vector<4x256xf32>, i32 -> vector<4x256xf32>
    %c1 = arith.constant 1 : index
    %c0_10 = arith.constant 0 : index
    %c0_11 = arith.constant 0 : index
    %15 = vector.load %arg3[%c1, %c0_10, %c0_11] : memref<9x1x256xf32, #tpu.memory_space<vmem>>, vector<1x1x256xf32>
    %16 = vector.shape_cast %15 : vector<1x1x256xf32> to vector<1x256xf32>
    %17 = vector.broadcast %16 : vector<1x256xf32> to vector<4x256xf32>
    %18 = arith.mulf %14, %17 : vector<4x256xf32>
    %c1_12 = arith.constant 1 : index
    %c0_13 = arith.constant 0 : index
    %c0_14 = arith.constant 0 : index
    %19 = vector.load %arg2[%c1_12, %c0_13, %c0_14] : memref<9x4x4xf32, #tpu.memory_space<vmem>>, vector<1x4x4xf32>
    %20 = vector.shape_cast %19 : vector<1x4x4xf32> to vector<4x4xf32>
    %cst_15 = arith.constant dense<0.000000e+00> : vector<4x256xf32>
    %21 = tpu.matmul %20, %18, %cst_15 {dimension_numbers = #tpu.dot_dimension_numbers<[1], [0], [0], [1], [0, 0, 1, 1], [], []>} : vector<4x4xf32>, vector<4x256xf32>, vector<4x256xf32> -> vector<4x256xf32>
    %22 = arith.addf %13, %21 : vector<4x256xf32>
    %c15_i32 = arith.constant 15 : i32
    %23 = tpu.dynamic_rotate %1 by %c15_i32 dim 1 : vector<4x256xf32>, i32 -> vector<4x256xf32>
    %c2 = arith.constant 2 : index
    %c0_16 = arith.constant 0 : index
    %c0_17 = arith.constant 0 : index
    %24 = vector.load %arg3[%c2, %c0_16, %c0_17] : memref<9x1x256xf32, #tpu.memory_space<vmem>>, vector<1x1x256xf32>
    %25 = vector.shape_cast %24 : vector<1x1x256xf32> to vector<1x256xf32>
    %26 = vector.broadcast %25 : vector<1x256xf32> to vector<4x256xf32>
    %27 = arith.mulf %23, %26 : vector<4x256xf32>
    %c2_18 = arith.constant 2 : index
    %c0_19 = arith.constant 0 : index
    %c0_20 = arith.constant 0 : index
    %28 = vector.load %arg2[%c2_18, %c0_19, %c0_20] : memref<9x4x4xf32, #tpu.memory_space<vmem>>, vector<1x4x4xf32>
    %29 = vector.shape_cast %28 : vector<1x4x4xf32> to vector<4x4xf32>
    %cst_21 = arith.constant dense<0.000000e+00> : vector<4x256xf32>
    %30 = tpu.matmul %29, %27, %cst_21 {dimension_numbers = #tpu.dot_dimension_numbers<[1], [0], [0], [1], [0, 0, 1, 1], [], []>} : vector<4x4xf32>, vector<4x256xf32>, vector<4x256xf32> -> vector<4x256xf32>
    %31 = arith.addf %22, %30 : vector<4x256xf32>
    %c1_i32 = arith.constant 1 : i32
    %32 = tpu.dynamic_rotate %1 by %c1_i32 dim 1 : vector<4x256xf32>, i32 -> vector<4x256xf32>
    %c3 = arith.constant 3 : index
    %c0_22 = arith.constant 0 : index
    %c0_23 = arith.constant 0 : index
    %33 = vector.load %arg3[%c3, %c0_22, %c0_23] : memref<9x1x256xf32, #tpu.memory_space<vmem>>, vector<1x1x256xf32>
    %34 = vector.shape_cast %33 : vector<1x1x256xf32> to vector<1x256xf32>
    %35 = vector.broadcast %34 : vector<1x256xf32> to vector<4x256xf32>
    %36 = arith.mulf %32, %35 : vector<4x256xf32>
    %c3_24 = arith.constant 3 : index
    %c0_25 = arith.constant 0 : index
    %c0_26 = arith.constant 0 : index
    %37 = vector.load %arg2[%c3_24, %c0_25, %c0_26] : memref<9x4x4xf32, #tpu.memory_space<vmem>>, vector<1x4x4xf32>
    %38 = vector.shape_cast %37 : vector<1x4x4xf32> to vector<4x4xf32>
    %cst_27 = arith.constant dense<0.000000e+00> : vector<4x256xf32>
    %39 = tpu.matmul %38, %36, %cst_27 {dimension_numbers = #tpu.dot_dimension_numbers<[1], [0], [0], [1], [0, 0, 1, 1], [], []>} : vector<4x4xf32>, vector<4x256xf32>, vector<4x256xf32> -> vector<4x256xf32>
    %40 = arith.addf %31, %39 : vector<4x256xf32>
    %c4 = arith.constant 4 : index
    %c0_28 = arith.constant 0 : index
    %c0_29 = arith.constant 0 : index
    %41 = vector.load %arg2[%c4, %c0_28, %c0_29] : memref<9x4x4xf32, #tpu.memory_space<vmem>>, vector<1x4x4xf32>
    %42 = vector.shape_cast %41 : vector<1x4x4xf32> to vector<4x4xf32>
    %cst_30 = arith.constant dense<0.000000e+00> : vector<4x256xf32>
    %43 = tpu.matmul %42, %1, %cst_30 {dimension_numbers = #tpu.dot_dimension_numbers<[1], [0], [0], [1], [0, 0, 1, 1], [], []>} : vector<4x4xf32>, vector<4x256xf32>, vector<4x256xf32> -> vector<4x256xf32>
    %44 = arith.addf %40, %43 : vector<4x256xf32>
    %c255_i32 = arith.constant 255 : i32
    %45 = tpu.dynamic_rotate %1 by %c255_i32 dim 1 : vector<4x256xf32>, i32 -> vector<4x256xf32>
    %c5 = arith.constant 5 : index
    %c0_31 = arith.constant 0 : index
    %c0_32 = arith.constant 0 : index
    %46 = vector.load %arg3[%c5, %c0_31, %c0_32] : memref<9x1x256xf32, #tpu.memory_space<vmem>>, vector<1x1x256xf32>
    %47 = vector.shape_cast %46 : vector<1x1x256xf32> to vector<1x256xf32>
    %48 = vector.broadcast %47 : vector<1x256xf32> to vector<4x256xf32>
    %49 = arith.mulf %45, %48 : vector<4x256xf32>
    %c5_33 = arith.constant 5 : index
    %c0_34 = arith.constant 0 : index
    %c0_35 = arith.constant 0 : index
    %50 = vector.load %arg2[%c5_33, %c0_34, %c0_35] : memref<9x4x4xf32, #tpu.memory_space<vmem>>, vector<1x4x4xf32>
    %51 = vector.shape_cast %50 : vector<1x4x4xf32> to vector<4x4xf32>
    %cst_36 = arith.constant dense<0.000000e+00> : vector<4x256xf32>
    %52 = tpu.matmul %51, %49, %cst_36 {dimension_numbers = #tpu.dot_dimension_numbers<[1], [0], [0], [1], [0, 0, 1, 1], [], []>} : vector<4x4xf32>, vector<4x256xf32>, vector<4x256xf32> -> vector<4x256xf32>
    %53 = arith.addf %44, %52 : vector<4x256xf32>
    %c241_i32 = arith.constant 241 : i32
    %54 = tpu.dynamic_rotate %1 by %c241_i32 dim 1 : vector<4x256xf32>, i32 -> vector<4x256xf32>
    %c6 = arith.constant 6 : index
    %c0_37 = arith.constant 0 : index
    %c0_38 = arith.constant 0 : index
    %55 = vector.load %arg3[%c6, %c0_37, %c0_38] : memref<9x1x256xf32, #tpu.memory_space<vmem>>, vector<1x1x256xf32>
    %56 = vector.shape_cast %55 : vector<1x1x256xf32> to vector<1x256xf32>
    %57 = vector.broadcast %56 : vector<1x256xf32> to vector<4x256xf32>
    %58 = arith.mulf %54, %57 : vector<4x256xf32>
    %c6_39 = arith.constant 6 : index
    %c0_40 = arith.constant 0 : index
    %c0_41 = arith.constant 0 : index
    %59 = vector.load %arg2[%c6_39, %c0_40, %c0_41] : memref<9x4x4xf32, #tpu.memory_space<vmem>>, vector<1x4x4xf32>
    %60 = vector.shape_cast %59 : vector<1x4x4xf32> to vector<4x4xf32>
    %cst_42 = arith.constant dense<0.000000e+00> : vector<4x256xf32>
    %61 = tpu.matmul %60, %58, %cst_42 {dimension_numbers = #tpu.dot_dimension_numbers<[1], [0], [0], [1], [0, 0, 1, 1], [], []>} : vector<4x4xf32>, vector<4x256xf32>, vector<4x256xf32> -> vector<4x256xf32>
    %62 = arith.addf %53, %61 : vector<4x256xf32>
    %c240_i32 = arith.constant 240 : i32
    %63 = tpu.dynamic_rotate %1 by %c240_i32 dim 1 : vector<4x256xf32>, i32 -> vector<4x256xf32>
    %c7 = arith.constant 7 : index
    %c0_43 = arith.constant 0 : index
    %c0_44 = arith.constant 0 : index
    %64 = vector.load %arg3[%c7, %c0_43, %c0_44] : memref<9x1x256xf32, #tpu.memory_space<vmem>>, vector<1x1x256xf32>
    %65 = vector.shape_cast %64 : vector<1x1x256xf32> to vector<1x256xf32>
    %66 = vector.broadcast %65 : vector<1x256xf32> to vector<4x256xf32>
    %67 = arith.mulf %63, %66 : vector<4x256xf32>
    %c7_45 = arith.constant 7 : index
    %c0_46 = arith.constant 0 : index
    %c0_47 = arith.constant 0 : index
    %68 = vector.load %arg2[%c7_45, %c0_46, %c0_47] : memref<9x4x4xf32, #tpu.memory_space<vmem>>, vector<1x4x4xf32>
    %69 = vector.shape_cast %68 : vector<1x4x4xf32> to vector<4x4xf32>
    %cst_48 = arith.constant dense<0.000000e+00> : vector<4x256xf32>
    %70 = tpu.matmul %69, %67, %cst_48 {dimension_numbers = #tpu.dot_dimension_numbers<[1], [0], [0], [1], [0, 0, 1, 1], [], []>} : vector<4x4xf32>, vector<4x256xf32>, vector<4x256xf32> -> vector<4x256xf32>
    %71 = arith.addf %62, %70 : vector<4x256xf32>
    %c239_i32 = arith.constant 239 : i32
    %72 = tpu.dynamic_rotate %1 by %c239_i32 dim 1 : vector<4x256xf32>, i32 -> vector<4x256xf32>
    %c8 = arith.constant 8 : index
    %c0_49 = arith.constant 0 : index
    %c0_50 = arith.constant 0 : index
    %73 = vector.load %arg3[%c8, %c0_49, %c0_50] : memref<9x1x256xf32, #tpu.memory_space<vmem>>, vector<1x1x256xf32>
    %74 = vector.shape_cast %73 : vector<1x1x256xf32> to vector<1x256xf32>
    %75 = vector.broadcast %74 : vector<1x256xf32> to vector<4x256xf32>
    %76 = arith.mulf %72, %75 : vector<4x256xf32>
    %c8_51 = arith.constant 8 : index
    %c0_52 = arith.constant 0 : index
    %c0_53 = arith.constant 0 : index
    %77 = vector.load %arg2[%c8_51, %c0_52, %c0_53] : memref<9x4x4xf32, #tpu.memory_space<vmem>>, vector<1x4x4xf32>
    %78 = vector.shape_cast %77 : vector<1x4x4xf32> to vector<4x4xf32>
    %cst_54 = arith.constant dense<0.000000e+00> : vector<4x256xf32>
    %79 = tpu.matmul %78, %76, %cst_54 {dimension_numbers = #tpu.dot_dimension_numbers<[1], [0], [0], [1], [0, 0, 1, 1], [], []>} : vector<4x4xf32>, vector<4x256xf32>, vector<4x256xf32> -> vector<4x256xf32>
    %80 = arith.addf %71, %79 : vector<4x256xf32>
    %c0_55 = arith.constant 0 : index
    %81 = memref.load %arg6[%c0_55] : memref<1xf32, #tpu.memory_space<smem>>
    %82 = arith.mulf %80, %80 : vector<4x256xf32>
    %83 = vector.broadcast %81 : f32 to vector<4x256xf32>
    %84 = arith.mulf %83, %82 : vector<4x256xf32>
    %c0_56 = arith.constant 0 : index
    %c0_57 = arith.constant 0 : index
    %85 = vector.load %arg5[%c0_56, %c0_57] : memref<4x1xf32, #tpu.memory_space<vmem>>, vector<4x1xf32>
    %86 = vector.broadcast %85 : vector<4x1xf32> to vector<4x256xf32>
    %87 = arith.addf %84, %86 : vector<4x256xf32>
    %88 = vector.shape_cast %87 : vector<4x256xf32> to vector<1x4x256xf32>
    %c0_58 = arith.constant 0 : index
    %c0_59 = arith.constant 0 : index
    %c0_60 = arith.constant 0 : index
    %89 = vector.load %arg7[%c0_58, %c0_59, %c0_60] : memref<1x4x256xf32, #tpu.memory_space<vmem>>, vector<1x4x256xf32>
    tpu.vector_store %arg7[%c0_58, %c0_59, %c0_60], %88 {strides = array<i32>} : memref<1x4x256xf32, #tpu.memory_space<vmem>>, vector<1x4x256xf32>,
    return
  }
  func.func @transform_0(%arg0: i32) -> (i32, i32, i32) {
    %c0_i32 = arith.constant 0 : i32
    %c0_i32_0 = arith.constant 0 : i32
    %c0_i32_1 = arith.constant 0 : i32
    return %arg0, %c0_i32, %c0_i32_0 : i32, i32, i32
  }
  func.func @transform_1(%arg0: i32) -> (i32, i32, i32) {
    %c0_i32 = arith.constant 0 : i32
    %c0_i32_0 = arith.constant 0 : i32
    %c0_i32_1 = arith.constant 0 : i32
    %c0_i32_2 = arith.constant 0 : i32
    return %c0_i32, %c0_i32_0, %c0_i32_1 : i32, i32, i32
  }
  func.func @transform_2(%arg0: i32) -> (i32, i32, i32) {
    %c0_i32 = arith.constant 0 : i32
    %c0_i32_0 = arith.constant 0 : i32
    %c0_i32_1 = arith.constant 0 : i32
    %c0_i32_2 = arith.constant 0 : i32
    return %c0_i32, %c0_i32_0, %c0_i32_1 : i32, i32, i32
  }
  func.func @transform_3(%arg0: i32) -> (i32, i32) {
    %c0_i32 = arith.constant 0 : i32
    %c0_i32_0 = arith.constant 0 : i32
    %c0_i32_1 = arith.constant 0 : i32
    return %c0_i32, %c0_i32_0 : i32, i32
  }
  func.func @transform_4(%arg0: i32) -> (i32, i32) {
    %c0_i32 = arith.constant 0 : i32
    %c0_i32_0 = arith.constant 0 : i32
    %c0_i32_1 = arith.constant 0 : i32
    return %c0_i32, %c0_i32_0 : i32, i32
  }
  func.func @transform_5(%arg0: i32) -> i32 {
    %c0_i32 = arith.constant 0 : i32
    %c0_i32_0 = arith.constant 0 : i32
    return %c0_i32 : i32
  }
  func.func @transform_6(%arg0: i32) -> (i32, i32, i32) {
    %c0_i32 = arith.constant 0 : i32
    %c0_i32_0 = arith.constant 0 : i32
    %c0_i32_1 = arith.constant 0 : i32
    return %arg0, %c0_i32, %c0_i32_0 : i32, i32, i32
  }
}

</mosaic_0001>

<bundles_post_ra>
// kernel: tpu_custom_call.1
= control target key start
LH: loop header
LB: loop body
LE: loop exit
PB: predicated region body
PF: predicated region fallthrough
CT: control target
= control target key end

     0   :  { %s1751_s0 = inlined_call_operand.vmem [shape: f32[2,4,256], index: 0, kind: input, shape index: {}]   ;;  %s1752_s1 = inlined_call_operand.vmem [shape: f32[9,4,4], index: 1, kind: input, shape index: {}]   ;;  %s1753_s2 = inlined_call_operand.vmem [shape: f32[9,1,256], index: 2, kind: input, shape index: {}]   ;;  %s1754_s3 = inlined_call_operand.vmem [shape: f32[4,1], index: 3, kind: input, shape index: {}]   ;;  %s1755_s4 = inlined_call_operand.vmem [shape: f32[4,1], index: 4, kind: input, shape index: {}]   ;;  %s1756_s5 = inlined_call_operand.<no memory space> [shape: f32[1], index: 5, kind: input, shape index: {}]   ;;  %s1757_s6 = inlined_call_operand.hbm [shape: f32[2,4,256], index: 6, kind: output, shape index: {}]  }
   0x1   :  { %11 = sst [smem:[#allocation2]] %s1756_s5 }
   0x2   :  { %12 = vsyncpa [#allocation4], 0 }
   0x3   :  { %14 = vsyncpa [#allocation4 + $0x1], 0  ;;  %s1505_s23 = smov 0   ;;  %s1507_s24 = smov 0  }
   0x4   :  { %s1509_s25 = smov 0   ;;  %s1511_s26 = smov 0  }
   0x5 LB: > { %s1526_s5 = sadd.s32 4294967295, %s1454_s26   ;;  %s1286_s27 = sadd.s32 4294967294, %s1454_s26   ;;  %s1454_s26 = sphi %s1511_s26, %s1763_s26   ;;  %s1450_s25 = sphi %s1509_s25, %s1762_s25   ;;  %s1446_s24 = sphi %s1507_s24, %s1761_s24   ;;  %s1442_s23 = sphi %s1505_s23, %s1760_s23  }
   0x6   : > { %s1530_s28 = sadd.s32 1, %s1454_s26   ;;  %s158_s29 = sadd.s32 1, %s1450_s25 }
   0x7   : > { %s155_s30 = ssub.s32 %s1454_s26, %s1530_s28  ;;  %p168_p0 = scmp.ne.s32.totalorder %s1450_s25, %s1446_s24 }
   0x8   : > { %p156_p1 = scmp.eq.s32.totalorder %s155_s30, 0  ;;  %p169_p2 = scmp.eq.s32.totalorder %s1526_s5, 1 }
   0x9   : > { %p174_p3 = scmp.ne.s32.totalorder %s1446_s24, %s1442_s23  ;;  %p175_p4 = scmp.eq.s32.totalorder %s1286_s27, 1 }
   0xa   : > { %s1541_s7 = scalar_select %p156_p1, %s1450_s25, %s158_s29  }
   0xb   : > { %p1543_p5 = por %p169_p2, %p168_p0  ;;  %p1547_p6 = por %p175_p4, %p174_p3 }
   0xc   : > { %p1289_p7 = scmp.ge.s32.totalorder %s1454_s26, 1  ;;  %p216_p8 = scmp.lt.s32.totalorder %s1454_s26, 3 }
   0xe   : > { %p217_p9 = pnand %p1289_p7, %p216_p8 }
   0xf   : > { %p246_p10 = scmp.lt.s32.totalorder (!%p217_p9), %s1526_s5, 1  ;;  %s1456_s15 = smov (!%p217_p9), 16  }
  0x10   : > { %220 = sbr.rel (%p217_p9) target bundleno = 392 (0x188), region = 44  ;;  %s1457_s16 = smov (!%p217_p9), 17  }
  0x11   : > { %s1459_s17 = smov (!%p217_p9), 15   ;;  %s1460_s18 = smov (!%p217_p9), 1  }
  0x12   : > { %s1461_s19 = smov (!%p217_p9), 127   ;;  %s1462_s20 = smov (!%p217_p9), 113  }
  0x13   : > { %s1464_s21 = smov (!%p217_p9), 112   ;;  %s1465_s22 = smov (!%p217_p9), 111  }
  0x14   : > { %s1193_s13 = sld [smem:[#allocation2]] (!%p217_p9)  ;;  %s1466_s29 = smov (!%p217_p9), [#allocation3]  }
  0x15   : > { %s247_s10 = scalar_select %p246_p10, %s1526_s5, 1  ;;  %v1458_v2 = vmov 0.0   ;;  %v1463_v3 = vmov 0   ;;  %v252_v4 = vld [vmem:[%s1754_s3] sm:$0xf]  ;;  %v265_v6 = vlaneseq  ;;  %vm289_vm1 = vcmask 1043456  }
  0x16   : > { %360 = vmatprep.mubr.f32.mxu0 %v1458_v2  ;;  %466 = vmatprep.mubr.f32.mxu1 %v1458_v2  ;;  %v1199_v5 = vld [vmem:[%s1755_s4] sm:$0xf]  ;;  %v1301_v21 = vld [vmem:[%s1753_s2 + $0x4] sm:$0x3]  ;;  %v1306_v22 = vld [vmem:[%s1753_s2 + $0x6] sm:$0x3] }
  0x17   : > { %s1340_s11 = sshll.u32 %s247_s10, 3  ;;  %1391 = vset.pattern.permute.xlu0 %v1463_v3  ;;  %1392 = vset.pattern.permute.xlu1 %v1463_v3  ;;  %v273_v7 = vshrl.u32 %v265_v6, 7  ;;  %v1588_v8 = vand.u32 127, %v265_v6  ;;  %v1296_v11 = vld [vmem:[%s1753_s2 + $0x2] sm:$0x3]  ;;  %vm285_vm5 = vcmask 31744  }
  0x18   : > { %s250_s14 = scalar_lea.vmem %s1751_s0, %s1340_s11  ;;  %v270_v16 = vld [vmem:[%s1753_s2] sm:$0x3]  ;;  %v1297_v27 = vld [vmem:[%s1752_s1 + $0x4] sm:$0xf]  ;;  %v1315_v40 = vld [vmem:[%s1753_s2 + $0xa] sm:$0x3] }
  0x19   : > { %v1558_v0 = vld [vmem:[%s250_s14] sm:$0xff]  ;;  %v1590_v9 = vsub.s32 0, %v273_v7  ;;  %v1592_v10 = vsub.s32 1, %v273_v7  ;;  %vm373_vm0 = vcmp.lt.s32.totalorder %v1588_v8, 16  ;;  %vm479_vm2 = vcmp.lt.s32.totalorder %v1588_v8, 15  ;;  %s243_s14 = sand.u32 1, %s1446_s24  }
  0x1a   : > { %369 = vrot.lane.b32.xlu1 %v1558_v0, %s1456_s15  ;;  %261 = vrot.lane.b32.xlu0 %v1558_v0, %s1457_s16  ;;  %v1564_v1 = vcombine.high %v1558_v0, %v1558_v0  ;;  %vm267_vm3 = vcmp.lt.s32.totalorder %v1588_v8, 17  ;;  %vm585_vm4 = vcmp.lt.s32.totalorder %v1588_v8, 1  ;;  %v284_v41 = vld [vmem:[%s1752_s1] sm:$0xf]  ;;  %vm773_vm6 = vcmp.lt.s32.totalorder %v1588_v8, 127  ;;  %s1398_s30 = sshll.u32 %s1466_s29, 4  ;;  %s1399_s30 = int_to_ptr.vmem [resolvable:$false] %s1398_s30 }
  0x1b   : > { %v382_v14 = vrot.slane %v1296_v11, %v1590_v9  ;;  %v386_v15 = vrot.slane %v1296_v11, %v1592_v10  ;;  %v275_v25 = vrot.slane %v270_v16, %v1590_v9  ;;  %v279_v26 = vrot.slane %v270_v16, %v1592_v10  ;;  %v1320_v52 = vld [vmem:[%s1753_s2 + $0xc] sm:$0x3]  ;;  %v1302_v53 = vld [vmem:[%s1752_s1 + $0x8] sm:$0xf]  ;;  %v1325_v63 = vld [vmem:[%s1753_s2 + $0xe] sm:$0x3] }
  0x1c   : > { %v488_v28 = vrot.slane %v1301_v21, %v1590_v9  ;;  %v492_v29 = vrot.slane %v1301_v21, %v1592_v10  ;;  %v594_v32 = vrot.slane %v1306_v22, %v1590_v9  ;;  %v598_v39 = vrot.slane %v1306_v22, %v1592_v10  ;;  %v1307_v54 = vld [vmem:[%s1752_s1 + $0xc] sm:$0xf]  ;;  %v1316_v3 = vld [vmem:[%s1752_s1 + $0x14] sm:$0xf] }
  0x1d   : > { %v782_v48 = vrot.slane %v1315_v40, %v1590_v9  ;;  %v786_v51 = vrot.slane %v1315_v40, %v1592_v10  ;;  %v888_v59 = vrot.slane %v1320_v52, %v1590_v9  ;;  %vm879_vm7 = vcmp.lt.s32.totalorder %v1588_v8, 113 }
  0x1e   : > { %475 = vrot.lane.b32.xlu0 %v1558_v0, %s1459_s17  ;;  %371 = vrot.lane.b32.xlu1 %v1564_v1, %s1456_s15  ;;  %v892_v62 = vrot.slane %v1320_v52, %v1592_v10  ;;  %vm985_vm8 = vcmp.lt.s32.totalorder %v1588_v8, 112  ;;  %vm1091_vm9 = vcmp.lt.s32.totalorder %v1588_v8, 111  ;;  %s1290_s15 = sshll.u32 %s243_s14, 3 }
  0x22   : > { %477 = vrot.lane.b32.xlu1 %v1564_v1, %s1459_s17  ;;  %263 = vrot.lane.b32.xlu0 %v1564_v1, %s1457_s16  ;;  %s1341_s16 = sshll.u32 %s1526_s5, 7  ;;  %s245_s17 = scalar_lea.vmem [#allocation3], %s1290_s15 }
  0x23   : > { %s1400_s5 = scalar_lea.vmem %s1399_s30, 256 }
  0x26   : > { %583 = vrot.lane.b32.xlu1 %v1564_v1, %s1460_s18  ;;  %581 = vrot.lane.b32.xlu0 %v1558_v0, %s1460_s18  ;;  %s1227_s18 = sshll.u32 %s245_s17, 4  ;;  %s1228_s18 = int_to_ptr.vmem [resolvable:$true] %s1227_s18 }
  0x27   : > { %s1394_s27 = scalar_lea.vmem %s1228_s18, 128  ;;  %p1401_p0 = scmp.lt.s32.totalorder %s1228_s18, %s1399_s30 }
  0x28   : > { %p1395_p11 = scmp.ne.s32.totalorder %s1228_s18, %s1394_s27  ;;  %p1402_p1 = scmp.lt.s32.totalorder %s1400_s5, %s1394_s27 }
  0x2a   : > { %771 = vrot.lane.b32.xlu1 %v1564_v1, %s1461_s19  ;;  %769 = vrot.lane.b32.xlu0 %v1558_v0, %s1461_s19  ;;  %p1396_p12 = pnand %p1395_p11, %p1543_p5  ;;  %p1403_p2 = por %p1402_p1, %p1401_p0 }
  0x2c   : > { %p1397_p13 = pneg %p1396_p12 }
  0x2e   : > { %877 = vrot.lane.b32.xlu1 %v1564_v1, %s1462_s20  ;;  %875 = vrot.lane.b32.xlu0 %v1558_v0, %s1462_s20  ;;  %p1404_p3 = pnand %p1403_p2, %p1397_p13 }
  0x32   : > { %983 = vrot.lane.b32.xlu1 %v1564_v1, %s1464_s21  ;;  %981 = vrot.lane.b32.xlu0 %v1558_v0, %s1464_s21  ;;  %s1225_s21 = scalar_lea.hbm %s1757_s6, %s1341_s16 }
  0x36   : > { %1089 = vrot.lane.b32.xlu1 %v1564_v1, %s1465_s22  ;;  %1087 = vrot.lane.b32.xlu0 %v1558_v0, %s1465_s22  ;;  %s1213_s22 = scalar_lea.sflag [#allocation4], %s243_s14 }
  0x3a   : > { %255 = vperm.xlu0 %1391, %v252_v4   ;;  %1202 = vperm.xlu1 %1392, %v1199_v5  }
  0x8c   : > { %v370_v12 = vpop.permute.xlu1 %369  ;;  %v262_v13 = vpop.permute.xlu0 %261 }
  0x90   : > { %v476_v17 = vpop.permute.xlu0 %475  ;;  %v372_v18 = vpop.permute.xlu1 %371 }
  0x91   : > { %v374_v19 = vsel %vm373_vm0, %v370_v12, %v372_v18  ;;  %v375_v20 = vsel %vm373_vm0, %v372_v18, %v370_v12 }
  0x92   : > { %v389_v23 = vmul.f32 %v382_v14, %v375_v20  ;;  %v390_v24 = vmul.f32 %v386_v15, %v374_v19  ;;  %v1330_v14 = vld [vmem:[%s1753_s2 + $0x10] sm:$0x3]  ;;  %v1321_v15 = vld [vmem:[%s1752_s1 + $0x18] sm:$0xf] }
  0x93   : > { %v1100_v22 = vrot.slane %v1330_v14, %v1590_v9 }
  0x94   : > { %1298 = vmatprep.subr.msk.mxu1 %vm289_vm1, %v390_v24  ;;  %v478_v30 = vpop.permute.xlu1 %477  ;;  %v264_v31 = vpop.permute.xlu0 %263  ;;  %v1326_v24 = vld [vmem:[%s1752_s1 + $0x1c] sm:$0xf] }
  0x95   : > { %v480_v33 = vsel %vm479_vm2, %v476_v17, %v478_v30  ;;  %v268_v34 = vsel %vm267_vm3, %v262_v13, %v264_v31  ;;  %v269_v35 = vsel %vm267_vm3, %v264_v31, %v262_v13  ;;  %1299 = vmatpush1.msk.msra.mxu1 %vm289_vm1, %v389_v23  ;;  %v481_v36 = vsel %vm479_vm2, %v478_v30, %v476_v17 }
  0x96   : > { %v282_v37 = vmul.f32 %v275_v25, %v269_v35  ;;  %v283_v38 = vmul.f32 %v279_v26, %v268_v34  ;;  %1300 = vmatmul.mubr.msk.f32.vlgmr.msra.gmra.mxu1 %vm285_vm5, %v1297_v27  ;;  %v496_v42 = vmul.f32 %v492_v29, %v480_v33  ;;  %v495_v45 = vmul.f32 %v488_v28, %v481_v36 }
  0x97   : > { %678 = vmatprep.mubr.f32.mxu1 %v1458_v2  ;;  %v998_v13 = vrot.slane %v1325_v63, %v1592_v10  ;;  %v1104_v23 = vrot.slane %v1330_v14, %v1592_v10  ;;  %v1331_v10 = vld [vmem:[%s1752_s1 + $0x20] sm:$0xf] }
  0x98   : > { %v584_v43 = vpop.permute.xlu1 %583  ;;  %1293 = vmatprep.subr.msk.mxu0 %vm289_vm1, %v283_v38  ;;  %v582_v44 = vpop.permute.xlu0 %581 }
  0x99   : > { %v586_v46 = vsel %vm585_vm4, %v582_v44, %v584_v43  ;;  %v587_v47 = vsel %vm585_vm4, %v584_v43, %v582_v44  ;;  %1294 = vmatpush1.msk.msra.mxu0 %vm289_vm1, %v282_v37 }
  0x9a   : > { %v601_v49 = vmul.f32 %v594_v32, %v587_v47  ;;  %v602_v50 = vmul.f32 %v598_v39, %v586_v46  ;;  %1303 = vmatprep.subr.msk.mxu0 %vm289_vm1, %v496_v42  ;;  %1295 = vmatmul.mubr.msk.f32.vlgmr.msra.gmra.mxu0 %vm285_vm5, %v284_v41 }
  0x9b   : > { %1304 = vmatpush1.msk.msra.mxu0 %vm289_vm1, %v495_v45  ;;  %572 = vmatprep.mubr.f32.mxu0 %v1458_v2 }
  0x9c   : > { %v772_v55 = vpop.permute.xlu1 %771  ;;  %1308 = vmatprep.subr.msk.mxu1 %vm289_vm1, %v602_v50  ;;  %v770_v56 = vpop.permute.xlu0 %769  ;;  %1312 = vmatprep.subr.msk.mxu0 %vm289_vm1, %v1564_v1  ;;  %v1311_v1 = vld [vmem:[%s1752_s1 + $0x10] sm:$0xf] }
  0x9d   : > { %v774_v57 = vsel %vm773_vm6, %v770_v56, %v772_v55  ;;  %v775_v58 = vsel %vm773_vm6, %v772_v55, %v770_v56  ;;  %1309 = vmatpush1.msk.msra.mxu1 %vm289_vm1, %v601_v49 }
  0x9e   : > { %v789_v60 = vmul.f32 %v782_v48, %v774_v57  ;;  %v790_v61 = vmul.f32 %v786_v51, %v775_v58  ;;  %1305 = vmatmul.mubr.msk.f32.vlgmr.msra.gmra.mxu0 %vm285_vm5, %v1302_v53  ;;  %1310 = vmatmul.mubr.msk.f32.vlgmr.msra.gmra.mxu1 %vm285_vm5, %v1307_v54 }
  0x9f   : > { %1313 = vmatpush1.msk.msra.mxu0 %vm289_vm1, %v1558_v0  ;;  %760 = vmatprep.mubr.f32.mxu0 %v1458_v2  ;;  %v994_v0 = vrot.slane %v1325_v63, %v1590_v9 }
  0xa0   : > { %v878_v4 = vpop.permute.xlu1 %877  ;;  %1317 = vmatprep.subr.msk.mxu1 %vm289_vm1, %v790_v61  ;;  %v876_v5 = vpop.permute.xlu0 %875  ;;  %866 = vmatprep.mubr.f32.mxu1 %v1458_v2 }
  0xa1   : > { %v880_v6 = vsel %vm879_vm7, %v876_v5, %v878_v4  ;;  %v881_v7 = vsel %vm879_vm7, %v878_v4, %v876_v5  ;;  %1318 = vmatpush1.msk.msra.mxu1 %vm289_vm1, %v789_v60 }
  0xa2   : > { %v895_v11 = vmul.f32 %v888_v59, %v880_v6  ;;  %v896_v12 = vmul.f32 %v892_v62, %v881_v7  ;;  %1314 = vmatmul.mubr.msk.f32.vlgmr.msra.gmra.mxu0 %vm285_vm5, %v1311_v1  ;;  %1319 = vmatmul.mubr.msk.f32.vlgmr.msra.gmra.mxu1 %vm285_vm5, %v1316_v3  ;;  %v1196_v1 = vstv %s1193_s13 }
  0xa3   : > { %972 = vmatprep.mubr.f32.mxu0 %v1458_v2  ;;  %1078 = vmatprep.mubr.f32.mxu1 %v1458_v2 }
  0xa4   : > { %v984_v16 = vpop.permute.xlu1 %983  ;;  %1322 = vmatprep.subr.msk.mxu0 %vm289_vm1, %v896_v12  ;;  %v982_v17 = vpop.permute.xlu0 %981 }
  0xa5   : > { %v986_v18 = vsel %vm985_vm8, %v982_v17, %v984_v16  ;;  %v987_v19 = vsel %vm985_vm8, %v984_v16, %v982_v17  ;;  %1323 = vmatpush1.msk.msra.mxu0 %vm289_vm1, %v895_v11 }
  0xa6   : > { %v1001_v20 = vmul.f32 %v994_v0, %v986_v18  ;;  %v1002_v21 = vmul.f32 %v998_v13, %v987_v19  ;;  %1324 = vmatmul.mubr.msk.f32.vlgmr.msra.gmra.mxu0 %vm285_vm5, %v1321_v15 }
  0xa7   : > { %1184 = vmatprep.mubr.f32.mxu0 %v1458_v2 }
  0xa8   : > { %v1090_v25 = vpop.permute.xlu1 %1089  ;;  %1327 = vmatprep.subr.msk.mxu1 %vm289_vm1, %v1002_v21  ;;  %v1088_v26 = vpop.permute.xlu0 %1087 }
  0xa9   : > { %v1092_v27 = vsel %vm1091_vm9, %v1088_v26, %v1090_v25  ;;  %v1093_v8 = vsel %vm1091_vm9, %v1090_v25, %v1088_v26  ;;  %1328 = vmatpush1.msk.msra.mxu1 %vm289_vm1, %v1001_v20 }
  0xaa   : > { %v1107_v28 = vmul.f32 %v1100_v22, %v1092_v27  ;;  %v1108_v9 = vmul.f32 %v1104_v23, %v1093_v8  ;;  %1329 = vmatmul.mubr.msk.f32.vlgmr.msra.gmra.mxu1 %vm285_vm5, %v1326_v24 }
  0xac   : > { %1332 = vmatprep.subr.msk.mxu0 %vm289_vm1, %v1108_v9 }
  0xad   : > { %1333 = vmatpush1.msk.msra.mxu0 %vm289_vm1, %v1107_v28 }
  0xae   : > { %1334 = vmatmul.mubr.msk.f32.vlgmr.msra.gmra.mxu0 %vm285_vm5, %v1331_v10 }
  0xb5   : > { %v256_v29 = vpop.permute.xlu0 %255  ;;  %v1203_v7 = vpop.permute.xlu1 %1202 }
 0x156   : > { %v468_v2 = vpop.f32.mrf.mxu1 }
 0x158   : > { %v470_v31 = vpop.f32.mrf.mxu1 }
 0x15a   : > { %v362_v30 = vpop.f32.mrf.mxu0 }
 0x15b   : > { %v367_v32 = vadd.f32 %v362_v30, %v256_v29 }
 0x15c   : > { %v364_v33 = vpop.f32.mrf.mxu0 }
 0x15d   : > { %v368_v34 = vadd.f32 %v364_v33, %v256_v29  ;;  %v473_v35 = vadd.f32 %v468_v2, %v367_v32 }
 0x15e   : > { %v574_v36 = vpop.f32.mrf.mxu0  ;;  %v680_v37 = vpop.f32.mrf.mxu1 }
 0x15f   : > { %v474_v38 = vadd.f32 %v470_v31, %v368_v34  ;;  %v579_v39 = vadd.f32 %v574_v36, %v473_v35 }
 0x160   : > { %v576_v40 = vpop.f32.mrf.mxu0  ;;  %v682_v41 = vpop.f32.mrf.mxu1 }
 0x161   : > { %v580_v42 = vadd.f32 %v576_v40, %v474_v38  ;;  %v685_v43 = vadd.f32 %v680_v37, %v579_v39 }
 0x162   : > { %v762_v44 = vpop.f32.mrf.mxu0  ;;  %v868_v45 = vpop.f32.mrf.mxu1 }
 0x163   : > { %v686_v46 = vadd.f32 %v682_v41, %v580_v42  ;;  %v767_v47 = vadd.f32 %v762_v44, %v685_v43 }
 0x164   : > { %v764_v48 = vpop.f32.mrf.mxu0  ;;  %v870_v49 = vpop.f32.mrf.mxu1 }
 0x165   : > { %v768_v50 = vadd.f32 %v764_v48, %v686_v46  ;;  %v873_v51 = vadd.f32 %v868_v45, %v767_v47 }
 0x166   : > { %v974_v52 = vpop.f32.mrf.mxu0 }
 0x167   : > { %v874_v53 = vadd.f32 %v870_v49, %v768_v50  ;;  %v979_v54 = vadd.f32 %v974_v52, %v873_v51 }
 0x168   : > { %v976_v55 = vpop.f32.mrf.mxu0 }
 0x169   : > { %v980_v57 = vadd.f32 %v976_v55, %v874_v53 }
 0x16a   : > { %v1080_v56 = vpop.f32.mrf.mxu1 }
 0x16b   : > { %v1085_v58 = vadd.f32 %v1080_v56, %v979_v54 }
 0x16c   : > { %v1082_v59 = vpop.f32.mrf.mxu1 }
 0x16d   : > { %v1086_v61 = vadd.f32 %v1082_v59, %v980_v57 }
 0x16e   : > { %v1186_v60 = vpop.f32.mrf.mxu0 }
 0x16f   : > { %v1191_v62 = vadd.f32 %v1186_v60, %v1085_v58 }
 0x170   : > { %v1188_v63 = vpop.f32.mrf.mxu0 }
 0x171   : > { %v1194_v3 = vmul.f32 %v1191_v62, %v1191_v62  ;;  %v1192_v4 = vadd.f32 %v1188_v63, %v1086_v61 }
 0x173   : > { %v1195_v5 = vmul.f32 %v1192_v4, %v1192_v4  ;;  %v1197_v6 = vmul.f32 %v1196_v1, %v1194_v3 }
 0x175   : > { %v1198_v0 = vmul.f32 %v1196_v1, %v1195_v5  ;;  %v1205_v11 = vadd.f32 %v1203_v7, %v1197_v6 }
 0x177   : > { %v1206_v12 = vadd.f32 %v1203_v7, %v1198_v0 }
 0x179   : > { %v1209_v13 = vcombine.low %v1205_v11, %v1206_v12 }
 0x17b   : > { %1211 = vst [vmem:[%s245_s17] sm:$0xff] %v1209_v13 }
 0x17c   : > { %1407 = shalt.err (!%p1404_p3)
}
 0x17d   : > { %s1408_s10 = scalar_lea.hbm %s1225_s21, 128  ;;  %s1412_s13 = scalar_lea.hbm %s1757_s6, 256 }
 0x17e   : > { %p1409_p4 = scmp.ne.s32.totalorder %s1225_s21, %s1408_s10  ;;  %p1413_p9 = scmp.lt.s32.totalorder %s1225_s21, %s1757_s6 }
 0x17f   : > { %p1414_p10 = scmp.lt.s32.totalorder %s1412_s13, %s1408_s10 }
 0x180   : > { %p1410_p7 = pnand %p1409_p4, %p1543_p5 }
 0x181   : > { %p1415_p11 = por %p1414_p10, %p1413_p9 }
 0x182   : > { %p1411_p8 = pneg %p1410_p7 }
 0x184   : > { %p1416_p12 = pnand %p1415_p11, %p1411_p8 }
 0x186   : > { %1419 = shalt.err (!%p1416_p12)
}
 0x187   : > { %1342 = dma.vmem_to_hbm [thread:$0]  (%p1543_p5), %s1228_s18, 128, %s1225_s21, %s1213_s22  }
 0x188 PF: > { %p1348_p13 = scmp.ge.s32.totalorder %s1454_s26, 2  ;;  %s1239_s16 = sand.u32 1, %s1442_s23  }
 0x189   : > { %s1240_s17 = scalar_lea.sflag [#allocation4], %s1239_s16 }
 0x18a   : > { %p1345_p0 = pnand %p1348_p13, %p1547_p6 }
 0x18c   : > { %p1346_p1 = pneg %p1345_p0 }
 0x18e   : > { %1437 = dma.done.wait (%p1346_p1), %s1240_s17, 128  }
 0x18f   : > { %1439 = vsyncadd (%p1346_p1), %s1240_s17, 4294967168  ;;  %p17_p2 = scmp.ge.s32.totalorder %s1530_s28, 4   ;;  %s1760_s23 = smov %s1446_s24 }
 0x190   : > { %s1761_s24 = smov %s1450_s25  ;;  %s1762_s25 = smov %s1541_s7 }
 0x191   : > { %s1763_s26 = smov %s1530_s28  ;;  %19 = sbr.rel (!%p17_p2) target bundleno = 5 (0x5), region = 94 }
 0x196   :  { %1245 = vsyncpa [#allocation4], 1 }
 0x197   :  { %1247 = vsyncpa [#allocation4 + $0x1], 1 }

</bundles_post_ra>
